<compile_context>
chip_gen: v7x
topology: tpu7x:2x2x1
jax: 0.10.0
libtpu: 0.0.40
codegen_flags: <defaults>
</compile_context>

<pallas_src>
import math
import functools
import numpy as np
import jax
import jax.numpy as jnp
from jax.experimental import pallas as pl
from jax.experimental.pallas import tpu as pltpu

# ---------------- Hyperparameters (mirror TCN.__init__ arguments) -----------
NUM_CHAR    = 16     # num_char (embedding vocab)
EM_DIM      = 8      # em_dim
CHANNEL     = 16     # channel_size
MAX_SEQ_LEN = 16     # max_seq_len (also the sequence length fed in)
KERNEL_SIZE = 3      # kernel_size
STRIDE      = 1      # stride (TCN assumes 1)
OUTPUT_SIZE = 1      # output_size
BATCH       = 2

assert STRIDE == 1, "causal TCN requires stride == 1"
# NOTE: like the PyTorch module, this silently truncates for hyperparameters
# off the power-of-two path.
LEVELS = int(math.log(MAX_SEQ_LEN / (KERNEL_SIZE - 1), 2))   # = 3
USE_DOWNSAMPLE = (EM_DIM != CHANNEL)                         # only level 0


# ------------------------------- Pallas kernel ------------------------------
def tcn_kernel(ids_ref, emb_ref, w1_ref, b1_ref, w2_ref, b2_ref,
               wd_ref, bd_ref, wl_ref, bl_ref, out_ref,
               *, levels, ksize, seq_len, batch, chan, num_char,
               use_downsample):
    bt = batch * seq_len

    # ---- fused embedding lookup: one-hot(ids) @ padded table (MXU) ----------
    ids = ids_ref[...]                                        # (B*T, 1) int32
    vocab = jax.lax.broadcasted_iota(jnp.int32, (bt, num_char), 1)
    onehot = (vocab == ids).astype(jnp.float32)               # (B*T, V)
    x = jnp.dot(onehot, emb_ref[...],
                preferred_element_type=jnp.float32)           # (B*T, C)

    # Load all (tiny) weights once.
    w1 = w1_ref[...]                                          # (L, K*C, C)
    b1 = b1_ref[...]                                          # (L, C)
    w2 = w2_ref[...]
    b2 = b2_ref[...]

    # Local time index of each row (row r = batch r//T, time r%T). Hoisted.
    local_t = jax.lax.broadcasted_iota(jnp.int32, (bt, chan), 0) % seq_len

    def shift_right(v, s):
        # y[b, t] = v[b, t - s], zeros for t < s  (causal left padding + chomp).
        # Roll on the flattened (B*T, C) slab goes to the XLU; rows that would
        # read across a batch boundary have local_t < s and are masked to 0.
        if s == 0:
            return v
        rolled = pltpu.roll(v, shift=s, axis=0)
        return jnp.where(local_t >= s, rolled, 0.0)

    def causal_conv(v, w_fused, bias, dil):
        # All K dilation taps fused into ONE (B*T, K*C) @ (K*C, C) MXU matmul.
        taps = [shift_right(v, (ksize - 1 - j) * dil) for j in range(ksize)]
        stacked = jnp.concatenate(taps, axis=1)               # (B*T, K*C)
        return jnp.dot(stacked, w_fused,
                       preferred_element_type=jnp.float32) + bias

    h = x
    for i in range(levels):
        dil = 2 ** i
        b1i = b1[i:i + 1, :]                                  # (1, C)
        b2i = b2[i:i + 1, :]
        # TemporalBlock.temp_block: conv->chomp->relu->dropout(id), twice
        o = jnp.maximum(causal_conv(h, w1[i], b1i, dil), 0.0)
        o = jnp.maximum(causal_conv(o, w2[i], b2i, dil), 0.0)
        # residual branch (1x1 conv only where in_channels != out_channels)
        if i == 0 and use_downsample:
            res = jnp.dot(h, wd_ref[...],
                          preferred_element_type=jnp.float32) + bd_ref[...]
        else:
            res = h
        h = jnp.maximum(o + res, 0.0)

    # Last time step of every batch element, single (B, C) @ (C, O) dot.
    last = jnp.concatenate(
        [h[(b + 1) * seq_len - 1:(b + 1) * seq_len, :] for b in range(batch)],
        axis=0)                                               # (B, C)
    out_ref[...] = jnp.dot(last, wl_ref[...],
                           preferred_element_type=jnp.float32) + bl_ref[...]


# ------------------------------- JAX wrapper ---------------------------------
def tcn_forward(token_ids, params):
    (emb_pad, w1f, b1, w2f, b2, wd, bd, wl, bl) = params

    # Only wrapper op: reshape the tiny int id tensor to a (B*T, 1) column so
    # the in-kernel one-hot broadcast is a pure lane broadcast.
    ids_col = token_ids.reshape(BATCH * MAX_SEQ_LEN, 1).astype(jnp.int32)

    kernel = functools.partial(
        tcn_kernel, levels=LEVELS, ksize=KERNEL_SIZE, seq_len=MAX_SEQ_LEN,
        batch=BATCH, chan=CHANNEL, num_char=NUM_CHAR,
        use_downsample=USE_DOWNSAMPLE)

    # Single invocation (no grid): every operand fits in VMEM as a whole
    # (< 25 KB total), so default whole-array blocks are used.
    out = pl.pallas_call(
        kernel,
        out_shape=jax.ShapeDtypeStruct((BATCH, OUTPUT_SIZE), jnp.float32),
    )(ids_col, emb_pad, w1f, b1, w2f, b2, wd, bd, wl, bl)

    return out.reshape(-1)                                     # x.view(-1)


# ------------------------- Pure-JAX reference (check) ------------------------
def tcn_reference(token_ids, params):
    (emb_pad, w1f, b1, w2f, b2, wd, bd, wl, bl) = params
    x = jnp.take(emb_pad, token_ids, axis=0)                   # (B, T, C)
    w1 = w1f.reshape(LEVELS, KERNEL_SIZE, CHANNEL, CHANNEL)
    w2 = w2f.reshape(LEVELS, KERNEL_SIZE, CHANNEL, CHANNEL)

    def causal_conv(v, w, b, dil):
        B, T, C = v.shape
        acc = jnp.zeros((B, T, C), jnp.float32)
        for j in range(KERNEL_SIZE):
            s = (KERNEL_SIZE - 1 - j) * dil
            vs = jnp.pad(v, ((0, 0), (s, 0), (0, 0)))[:, :T, :]
            acc = acc + jnp.einsum('btc,cd->btd', vs, w[j])
        return acc + b[None, None, :]

    h = x
    for i in range(LEVELS):
        dil = 2 ** i
        o = jax.nn.relu(causal_conv(h, w1[i], b1[i], dil))
        o = jax.nn.relu(causal_conv(o, w2[i], b2[i], dil))
        if i == 0 and USE_DOWNSAMPLE:
            res = jnp.einsum('btc,cd->btd', h, wd) + bd[None, :, :]
        else:
            res = h
        h = jax.nn.relu(o + res)
    last = h[:, -1, :]
    return (last @ wl + bl).reshape(-1)


# --------------------------- Deterministic params ----------------------------
def init_params(key):
    keys = jax.random.split(key, 4 * LEVELS + 8)               # plenty of keys
    ki = iter(keys)

    emb = jax.random.normal(next(ki), (NUM_CHAR, EM_DIM), jnp.float32) * 0.5
    # Pre-pad the embedding table once (EM_DIM -> CHANNEL columns).
    emb_pad = jnp.pad(emb, ((0, 0), (0, CHANNEL - EM_DIM)))    # (V, C)

    w1s, b1s, w2s, b2s = [], [], [], []
    for i in range(LEVELS):
        in_c = EM_DIM if i == 0 else CHANNEL
        scale = 1.0 / math.sqrt(in_c * KERNEL_SIZE)
        # PyTorch Conv1d weight (out_c, in_c, k) -> kernel layout (k, in_c, out_c)
        wa = jax.random.normal(next(ki), (CHANNEL, in_c, KERNEL_SIZE),
                               jnp.float32) * scale
        ba = jax.random.normal(next(ki), (CHANNEL,), jnp.float32) * 0.1
        scale2 = 1.0 / math.sqrt(CHANNEL * KERNEL_SIZE)
        wb = jax.random.normal(next(ki), (CHANNEL, CHANNEL, KERNEL_SIZE),
                               jnp.float32) * scale2
        bb = jax.random.normal(next(ki), (CHANNEL,), jnp.float32) * 0.1

        wa_k = jnp.transpose(wa, (2, 1, 0))                    # (K, in_c, C)
        wa_k = jnp.pad(wa_k, ((0, 0), (0, CHANNEL - in_c), (0, 0)))  # (K, C, C)
        wb_k = jnp.transpose(wb, (2, 1, 0))                    # (K, C, C)
        w1s.append(wa_k); b1s.append(ba)
        w2s.append(wb_k); b2s.append(bb)

    # Fuse conv taps host-side: (L, K, C, C) -> (L, K*C, C), tap-major rows.
    w1f = jnp.stack(w1s).reshape(LEVELS, KERNEL_SIZE * CHANNEL, CHANNEL)
    w2f = jnp.stack(w2s).reshape(LEVELS, KERNEL_SIZE * CHANNEL, CHANNEL)
    b1 = jnp.stack(b1s)
    b2 = jnp.stack(b2s)

    # downsample 1x1 conv for level 0 (em_dim -> channel_size)
    wd_t = jax.random.normal(next(ki), (CHANNEL, EM_DIM),
                             jnp.float32) * (1.0 / math.sqrt(EM_DIM))
    wd = jnp.pad(wd_t.T, ((0, CHANNEL - EM_DIM), (0, 0)))      # (C, C)
    bd = (jax.random.normal(next(ki), (CHANNEL,),
                            jnp.float32) * 0.1).reshape(1, CHANNEL)

    # final Linear(channel_size, output_size)
    wl_t = jax.random.normal(next(ki), (OUTPUT_SIZE, CHANNEL),
                             jnp.float32) * (1.0 / math.sqrt(CHANNEL))
    wl = wl_t.T                                                # (C, O)
    bl = (jax.random.normal(next(ki), (OUTPUT_SIZE,),
                            jnp.float32) * 0.1).reshape(1, OUTPUT_SIZE)

    return (emb_pad, w1f, b1, w2f, b2, wd, bd, wl, bl)


# ------------------------------------ main ------------------------------------
if __name__ == "__main__":
    key = jax.random.PRNGKey(0)
    k_tok, k_par = jax.random.split(key)

    token_ids = jax.random.randint(k_tok, (BATCH, MAX_SEQ_LEN), 0, NUM_CHAR,
                                   dtype=jnp.int32)
    params = init_params(k_par)

    out = jax.block_until_ready(tcn_forward(token_ids, params))
    ref = jax.block_until_ready(tcn_reference(token_ids, params))
    np.testing.assert_allclose(np.asarray(out), np.asarray(ref),
                               rtol=2e-2, atol=2e-2)

    print("KERNEL_OK")
</pallas_src>

<mosaic_0001>
module attributes {stable_mosaic.version = 11 : i64} {
  func.func @tcn_kernel(%arg0: memref<32x1xi32, #tpu.memory_space<vmem>>, %arg1: memref<16x16xf32, #tpu.memory_space<vmem>>, %arg2: memref<3x48x16xf32, #tpu.memory_space<vmem>>, %arg3: memref<3x16xf32, #tpu.memory_space<vmem>>, %arg4: memref<3x48x16xf32, #tpu.memory_space<vmem>>, %arg5: memref<3x16xf32, #tpu.memory_space<vmem>>, %arg6: memref<16x16xf32, #tpu.memory_space<vmem>>, %arg7: memref<1x16xf32, #tpu.memory_space<vmem>>, %arg8: memref<16x1xf32, #tpu.memory_space<vmem>>, %arg9: memref<1x1xf32, #tpu.memory_space<vmem>>, %arg10: memref<2x1xf32, #tpu.memory_space<vmem>>) attributes {dimension_semantics = [], scalar_prefetch = 0 : i64, scratch_operands = 0 : i64, tpu.core_type = #tpu.core_type<tc>} {
    %c0 = arith.constant 0 : index
    %c0_0 = arith.constant 0 : index
    %0 = vector.load %arg0[%c0, %c0_0] : memref<32x1xi32, #tpu.memory_space<vmem>>, vector<32x1xi32>
    %1 = tpu.iota {dimensions = array<i32: 1>} : vector<32x16xi32>
    %2 = vector.broadcast %0 : vector<32x1xi32> to vector<32x16xi32>
    %3 = arith.cmpi eq, %1, %2 : vector<32x16xi32>
    %4 = arith.extui %3 : vector<32x16xi1> to vector<32x16xi32>
    %5 = arith.sitofp %4 : vector<32x16xi32> to vector<32x16xf32>
    %c0_1 = arith.constant 0 : index
    %c0_2 = arith.constant 0 : index
    %6 = vector.load %arg1[%c0_1, %c0_2] : memref<16x16xf32, #tpu.memory_space<vmem>>, vector<16x16xf32>
    %cst = arith.constant dense<0.000000e+00> : vector<32x16xf32>
    %7 = tpu.matmul %5, %6, %cst {dimension_numbers = #tpu.dot_dimension_numbers<[1], [0], [0], [1], [0, 0, 1, 1], [], []>} : vector<32x16xf32>, vector<16x16xf32>, vector<32x16xf32> -> vector<32x16xf32>
    %c0_3 = arith.constant 0 : index
    %c0_4 = arith.constant 0 : index
    %c0_5 = arith.constant 0 : index
    %8 = vector.load %arg2[%c0_3, %c0_4, %c0_5] : memref<3x48x16xf32, #tpu.memory_space<vmem>>, vector<3x48x16xf32>
    %c0_6 = arith.constant 0 : index
    %c0_7 = arith.constant 0 : index
    %9 = vector.load %arg3[%c0_6, %c0_7] : memref<3x16xf32, #tpu.memory_space<vmem>>, vector<3x16xf32>
    %c0_8 = arith.constant 0 : index
    %c0_9 = arith.constant 0 : index
    %c0_10 = arith.constant 0 : index
    %10 = vector.load %arg4[%c0_8, %c0_9, %c0_10] : memref<3x48x16xf32, #tpu.memory_space<vmem>>, vector<3x48x16xf32>
    %c0_11 = arith.constant 0 : index
    %c0_12 = arith.constant 0 : index
    %11 = vector.load %arg5[%c0_11, %c0_12] : memref<3x16xf32, #tpu.memory_space<vmem>>, vector<3x16xf32>
    %12 = tpu.iota {dimensions = array<i32: 0>} : vector<32x16xi32>
    %c16_i32 = arith.constant 16 : i32
    %c0_i32 = arith.constant 0 : i32
    %13 = arith.cmpi eq, %c16_i32, %c0_i32 : i32
    %c1_i32 = arith.constant 1 : i32
    %14 = arith.select %13, %c1_i32, %c16_i32 : i32
    %15 = vector.broadcast %14 : i32 to vector<32x16xi32>
    %16 = arith.remsi %12, %15 : vector<32x16xi32>
    %c0_i32_13 = arith.constant 0 : i32
    %17 = vector.broadcast %c0_i32_13 : i32 to vector<32x16xi32>
    %18 = arith.cmpi ne, %16, %17 : vector<32x16xi32>
    %c0_i32_14 = arith.constant 0 : i32
    %19 = vector.broadcast %c0_i32_14 : i32 to vector<32x16xi32>
    %20 = arith.cmpi slt, %16, %19 : vector<32x16xi32>
    %c0_i32_15 = arith.constant 0 : i32
    %21 = arith.cmpi slt, %14, %c0_i32_15 : i32
    %22 = vector.broadcast %21 : i1 to vector<32x16xi1>
    %23 = vector.broadcast %22 : vector<32x16xi1> to vector<32x16xi1>
    %24 = arith.xori %20, %23 : vector<32x16xi1>
    %25 = arith.andi %24, %18 : vector<32x16xi1>
    %26 = vector.broadcast %14 : i32 to vector<32x16xi32>
    %27 = arith.addi %16, %26 : vector<32x16xi32>
    %28 = arith.select %25, %27, %16 : vector<32x16xi1>, vector<32x16xi32>
    %29 = vector.extract_strided_slice %9 {offsets = [0, 0], sizes = [1, 16], strides = [1, 1]} : vector<3x16xf32> to vector<1x16xf32>
    %30 = vector.extract_strided_slice %11 {offsets = [0, 0], sizes = [1, 16], strides = [1, 1]} : vector<3x16xf32> to vector<1x16xf32>
    %31 = vector.extract_strided_slice %8 {offsets = [0, 0, 0], sizes = [1, 48, 16], strides = [1, 1, 1]} : vector<3x48x16xf32> to vector<1x48x16xf32>
    %32 = vector.shape_cast %31 : vector<1x48x16xf32> to vector<48x16xf32>
    %c2_i32 = arith.constant 2 : i32
    %33 = tpu.dynamic_rotate %7 by %c2_i32 dim 0 : vector<32x16xf32>, i32 -> vector<32x16xf32>
    %c2_i32_16 = arith.constant 2 : i32
    %34 = vector.broadcast %c2_i32_16 : i32 to vector<32x16xi32>
    %35 = arith.cmpi sge, %28, %34 : vector<32x16xi32>
    %cst_17 = arith.constant 0.000000e+00 : f32
    %36 = vector.broadcast %cst_17 : f32 to vector<32x16xf32>
    %37 = arith.select %35, %33, %36 : vector<32x16xi1>, vector<32x16xf32>
    %c1_i32_18 = arith.constant 1 : i32
    %38 = tpu.dynamic_rotate %7 by %c1_i32_18 dim 0 : vector<32x16xf32>, i32 -> vector<32x16xf32>
    %c1_i32_19 = arith.constant 1 : i32
    %39 = vector.broadcast %c1_i32_19 : i32 to vector<32x16xi32>
    %40 = arith.cmpi sge, %28, %39 : vector<32x16xi32>
    %cst_20 = arith.constant 0.000000e+00 : f32
    %41 = vector.broadcast %cst_20 : f32 to vector<32x16xf32>
    %42 = arith.select %40, %38, %41 : vector<32x16xi1>, vector<32x16xf32>
    %43 = tpu.concatenate %37, %42, %7 in 1 : vector<32x16xf32>, vector<32x16xf32>, vector<32x16xf32> -> vector<32x48xf32>
    %cst_21 = arith.constant dense<0.000000e+00> : vector<32x16xf32>
    %44 = tpu.matmul %43, %32, %cst_21 {dimension_numbers = #tpu.dot_dimension_numbers<[1], [0], [0], [1], [0, 0, 1, 1], [], []>} : vector<32x48xf32>, vector<48x16xf32>, vector<32x16xf32> -> vector<32x16xf32>
    %45 = vector.broadcast %29 : vector<1x16xf32> to vector<32x16xf32>
    %46 = arith.addf %44, %45 : vector<32x16xf32>
    %cst_22 = arith.constant 0.000000e+00 : f32
    %47 = vector.broadcast %cst_22 : f32 to vector<32x16xf32>
    %48 = arith.maximumf %46, %47 : vector<32x16xf32>
    %49 = vector.extract_strided_slice %10 {offsets = [0, 0, 0], sizes = [1, 48, 16], strides = [1, 1, 1]} : vector<3x48x16xf32> to vector<1x48x16xf32>
    %50 = vector.shape_cast %49 : vector<1x48x16xf32> to vector<48x16xf32>
    %c2_i32_23 = arith.constant 2 : i32
    %51 = tpu.dynamic_rotate %48 by %c2_i32_23 dim 0 : vector<32x16xf32>, i32 -> vector<32x16xf32>
    %c2_i32_24 = arith.constant 2 : i32
    %52 = vector.broadcast %c2_i32_24 : i32 to vector<32x16xi32>
    %53 = arith.cmpi sge, %28, %52 : vector<32x16xi32>
    %cst_25 = arith.constant 0.000000e+00 : f32
    %54 = vector.broadcast %cst_25 : f32 to vector<32x16xf32>
    %55 = arith.select %53, %51, %54 : vector<32x16xi1>, vector<32x16xf32>
    %c1_i32_26 = arith.constant 1 : i32
    %56 = tpu.dynamic_rotate %48 by %c1_i32_26 dim 0 : vector<32x16xf32>, i32 -> vector<32x16xf32>
    %c1_i32_27 = arith.constant 1 : i32
    %57 = vector.broadcast %c1_i32_27 : i32 to vector<32x16xi32>
    %58 = arith.cmpi sge, %28, %57 : vector<32x16xi32>
    %cst_28 = arith.constant 0.000000e+00 : f32
    %59 = vector.broadcast %cst_28 : f32 to vector<32x16xf32>
    %60 = arith.select %58, %56, %59 : vector<32x16xi1>, vector<32x16xf32>
    %61 = tpu.concatenate %55, %60, %48 in 1 : vector<32x16xf32>, vector<32x16xf32>, vector<32x16xf32> -> vector<32x48xf32>
    %cst_29 = arith.constant dense<0.000000e+00> : vector<32x16xf32>
    %62 = tpu.matmul %61, %50, %cst_29 {dimension_numbers = #tpu.dot_dimension_numbers<[1], [0], [0], [1], [0, 0, 1, 1], [], []>} : vector<32x48xf32>, vector<48x16xf32>, vector<32x16xf32> -> vector<32x16xf32>
    %63 = vector.broadcast %30 : vector<1x16xf32> to vector<32x16xf32>
    %64 = arith.addf %62, %63 : vector<32x16xf32>
    %cst_30 = arith.constant 0.000000e+00 : f32
    %65 = vector.broadcast %cst_30 : f32 to vector<32x16xf32>
    %66 = arith.maximumf %64, %65 : vector<32x16xf32>
    %c0_31 = arith.constant 0 : index
    %c0_32 = arith.constant 0 : index
    %67 = vector.load %arg6[%c0_31, %c0_32] : memref<16x16xf32, #tpu.memory_space<vmem>>, vector<16x16xf32>
    %cst_33 = arith.constant dense<0.000000e+00> : vector<32x16xf32>
    %68 = tpu.matmul %7, %67, %cst_33 {dimension_numbers = #tpu.dot_dimension_numbers<[1], [0], [0], [1], [0, 0, 1, 1], [], []>} : vector<32x16xf32>, vector<16x16xf32>, vector<32x16xf32> -> vector<32x16xf32>
    %c0_34 = arith.constant 0 : index
    %c0_35 = arith.constant 0 : index
    %69 = vector.load %arg7[%c0_34, %c0_35] : memref<1x16xf32, #tpu.memory_space<vmem>>, vector<1x16xf32>
    %70 = vector.broadcast %69 : vector<1x16xf32> to vector<32x16xf32>
    %71 = arith.addf %68, %70 : vector<32x16xf32>
    %72 = arith.addf %66, %71 : vector<32x16xf32>
    %cst_36 = arith.constant 0.000000e+00 : f32
    %73 = vector.broadcast %cst_36 : f32 to vector<32x16xf32>
    %74 = arith.maximumf %72, %73 : vector<32x16xf32>
    %75 = vector.extract_strided_slice %9 {offsets = [1, 0], sizes = [1, 16], strides = [1, 1]} : vector<3x16xf32> to vector<1x16xf32>
    %76 = vector.extract_strided_slice %11 {offsets = [1, 0], sizes = [1, 16], strides = [1, 1]} : vector<3x16xf32> to vector<1x16xf32>
    %77 = vector.extract_strided_slice %8 {offsets = [1, 0, 0], sizes = [1, 48, 16], strides = [1, 1, 1]} : vector<3x48x16xf32> to vector<1x48x16xf32>
    %78 = vector.shape_cast %77 : vector<1x48x16xf32> to vector<48x16xf32>
    %c4_i32 = arith.constant 4 : i32
    %79 = tpu.dynamic_rotate %74 by %c4_i32 dim 0 : vector<32x16xf32>, i32 -> vector<32x16xf32>
    %c4_i32_37 = arith.constant 4 : i32
    %80 = vector.broadcast %c4_i32_37 : i32 to vector<32x16xi32>
    %81 = arith.cmpi sge, %28, %80 : vector<32x16xi32>
    %cst_38 = arith.constant 0.000000e+00 : f32
    %82 = vector.broadcast %cst_38 : f32 to vector<32x16xf32>
    %83 = arith.select %81, %79, %82 : vector<32x16xi1>, vector<32x16xf32>
    %c2_i32_39 = arith.constant 2 : i32
    %84 = tpu.dynamic_rotate %74 by %c2_i32_39 dim 0 : vector<32x16xf32>, i32 -> vector<32x16xf32>
    %c2_i32_40 = arith.constant 2 : i32
    %85 = vector.broadcast %c2_i32_40 : i32 to vector<32x16xi32>
    %86 = arith.cmpi sge, %28, %85 : vector<32x16xi32>
    %cst_41 = arith.constant 0.000000e+00 : f32
    %87 = vector.broadcast %cst_41 : f32 to vector<32x16xf32>
    %88 = arith.select %86, %84, %87 : vector<32x16xi1>, vector<32x16xf32>
    %89 = tpu.concatenate %83, %88, %74 in 1 : vector<32x16xf32>, vector<32x16xf32>, vector<32x16xf32> -> vector<32x48xf32>
    %cst_42 = arith.constant dense<0.000000e+00> : vector<32x16xf32>
    %90 = tpu.matmul %89, %78, %cst_42 {dimension_numbers = #tpu.dot_dimension_numbers<[1], [0], [0], [1], [0, 0, 1, 1], [], []>} : vector<32x48xf32>, vector<48x16xf32>, vector<32x16xf32> -> vector<32x16xf32>
    %91 = vector.broadcast %75 : vector<1x16xf32> to vector<32x16xf32>
    %92 = arith.addf %90, %91 : vector<32x16xf32>
    %cst_43 = arith.constant 0.000000e+00 : f32
    %93 = vector.broadcast %cst_43 : f32 to vector<32x16xf32>
    %94 = arith.maximumf %92, %93 : vector<32x16xf32>
    %95 = vector.extract_strided_slice %10 {offsets = [1, 0, 0], sizes = [1, 48, 16], strides = [1, 1, 1]} : vector<3x48x16xf32> to vector<1x48x16xf32>
    %96 = vector.shape_cast %95 : vector<1x48x16xf32> to vector<48x16xf32>
    %c4_i32_44 = arith.constant 4 : i32
    %97 = tpu.dynamic_rotate %94 by %c4_i32_44 dim 0 : vector<32x16xf32>, i32 -> vector<32x16xf32>
    %c4_i32_45 = arith.constant 4 : i32
    %98 = vector.broadcast %c4_i32_45 : i32 to vector<32x16xi32>
    %99 = arith.cmpi sge, %28, %98 : vector<32x16xi32>
    %cst_46 = arith.constant 0.000000e+00 : f32
    %100 = vector.broadcast %cst_46 : f32 to vector<32x16xf32>
    %101 = arith.select %99, %97, %100 : vector<32x16xi1>, vector<32x16xf32>
    %c2_i32_47 = arith.constant 2 : i32
    %102 = tpu.dynamic_rotate %94 by %c2_i32_47 dim 0 : vector<32x16xf32>, i32 -> vector<32x16xf32>
    %c2_i32_48 = arith.constant 2 : i32
    %103 = vector.broadcast %c2_i32_48 : i32 to vector<32x16xi32>
    %104 = arith.cmpi sge, %28, %103 : vector<32x16xi32>
    %cst_49 = arith.constant 0.000000e+00 : f32
    %105 = vector.broadcast %cst_49 : f32 to vector<32x16xf32>
    %106 = arith.select %104, %102, %105 : vector<32x16xi1>, vector<32x16xf32>
    %107 = tpu.concatenate %101, %106, %94 in 1 : vector<32x16xf32>, vector<32x16xf32>, vector<32x16xf32> -> vector<32x48xf32>
    %cst_50 = arith.constant dense<0.000000e+00> : vector<32x16xf32>
    %108 = tpu.matmul %107, %96, %cst_50 {dimension_numbers = #tpu.dot_dimension_numbers<[1], [0], [0], [1], [0, 0, 1, 1], [], []>} : vector<32x48xf32>, vector<48x16xf32>, vector<32x16xf32> -> vector<32x16xf32>
    %109 = vector.broadcast %76 : vector<1x16xf32> to vector<32x16xf32>
    %110 = arith.addf %108, %109 : vector<32x16xf32>
    %cst_51 = arith.constant 0.000000e+00 : f32
    %111 = vector.broadcast %cst_51 : f32 to vector<32x16xf32>
    %112 = arith.maximumf %110, %111 : vector<32x16xf32>
    %113 = arith.addf %112, %74 : vector<32x16xf32>
    %cst_52 = arith.constant 0.000000e+00 : f32
    %114 = vector.broadcast %cst_52 : f32 to vector<32x16xf32>
    %115 = arith.maximumf %113, %114 : vector<32x16xf32>
    %116 = vector.extract_strided_slice %9 {offsets = [2, 0], sizes = [1, 16], strides = [1, 1]} : vector<3x16xf32> to vector<1x16xf32>
    %117 = vector.extract_strided_slice %11 {offsets = [2, 0], sizes = [1, 16], strides = [1, 1]} : vector<3x16xf32> to vector<1x16xf32>
    %118 = vector.extract_strided_slice %8 {offsets = [2, 0, 0], sizes = [1, 48, 16], strides = [1, 1, 1]} : vector<3x48x16xf32> to vector<1x48x16xf32>
    %119 = vector.shape_cast %118 : vector<1x48x16xf32> to vector<48x16xf32>
    %c8_i32 = arith.constant 8 : i32
    %120 = tpu.dynamic_rotate %115 by %c8_i32 dim 0 : vector<32x16xf32>, i32 -> vector<32x16xf32>
    %c8_i32_53 = arith.constant 8 : i32
    %121 = vector.broadcast %c8_i32_53 : i32 to vector<32x16xi32>
    %122 = arith.cmpi sge, %28, %121 : vector<32x16xi32>
    %cst_54 = arith.constant 0.000000e+00 : f32
    %123 = vector.broadcast %cst_54 : f32 to vector<32x16xf32>
    %124 = arith.select %122, %120, %123 : vector<32x16xi1>, vector<32x16xf32>
    %c4_i32_55 = arith.constant 4 : i32
    %125 = tpu.dynamic_rotate %115 by %c4_i32_55 dim 0 : vector<32x16xf32>, i32 -> vector<32x16xf32>
    %c4_i32_56 = arith.constant 4 : i32
    %126 = vector.broadcast %c4_i32_56 : i32 to vector<32x16xi32>
    %127 = arith.cmpi sge, %28, %126 : vector<32x16xi32>
    %cst_57 = arith.constant 0.000000e+00 : f32
    %128 = vector.broadcast %cst_57 : f32 to vector<32x16xf32>
    %129 = arith.select %127, %125, %128 : vector<32x16xi1>, vector<32x16xf32>
    %130 = tpu.concatenate %124, %129, %115 in 1 : vector<32x16xf32>, vector<32x16xf32>, vector<32x16xf32> -> vector<32x48xf32>
    %cst_58 = arith.constant dense<0.000000e+00> : vector<32x16xf32>
    %131 = tpu.matmul %130, %119, %cst_58 {dimension_numbers = #tpu.dot_dimension_numbers<[1], [0], [0], [1], [0, 0, 1, 1], [], []>} : vector<32x48xf32>, vector<48x16xf32>, vector<32x16xf32> -> vector<32x16xf32>
    %132 = vector.broadcast %116 : vector<1x16xf32> to vector<32x16xf32>
    %133 = arith.addf %131, %132 : vector<32x16xf32>
    %cst_59 = arith.constant 0.000000e+00 : f32
    %134 = vector.broadcast %cst_59 : f32 to vector<32x16xf32>
    %135 = arith.maximumf %133, %134 : vector<32x16xf32>
    %136 = vector.extract_strided_slice %10 {offsets = [2, 0, 0], sizes = [1, 48, 16], strides = [1, 1, 1]} : vector<3x48x16xf32> to vector<1x48x16xf32>
    %137 = vector.shape_cast %136 : vector<1x48x16xf32> to vector<48x16xf32>
    %c8_i32_60 = arith.constant 8 : i32
    %138 = tpu.dynamic_rotate %135 by %c8_i32_60 dim 0 : vector<32x16xf32>, i32 -> vector<32x16xf32>
    %c8_i32_61 = arith.constant 8 : i32
    %139 = vector.broadcast %c8_i32_61 : i32 to vector<32x16xi32>
    %140 = arith.cmpi sge, %28, %139 : vector<32x16xi32>
    %cst_62 = arith.constant 0.000000e+00 : f32
    %141 = vector.broadcast %cst_62 : f32 to vector<32x16xf32>
    %142 = arith.select %140, %138, %141 : vector<32x16xi1>, vector<32x16xf32>
    %c4_i32_63 = arith.constant 4 : i32
    %143 = tpu.dynamic_rotate %135 by %c4_i32_63 dim 0 : vector<32x16xf32>, i32 -> vector<32x16xf32>
    %c4_i32_64 = arith.constant 4 : i32
    %144 = vector.broadcast %c4_i32_64 : i32 to vector<32x16xi32>
    %145 = arith.cmpi sge, %28, %144 : vector<32x16xi32>
    %cst_65 = arith.constant 0.000000e+00 : f32
    %146 = vector.broadcast %cst_65 : f32 to vector<32x16xf32>
    %147 = arith.select %145, %143, %146 : vector<32x16xi1>, vector<32x16xf32>
    %148 = tpu.concatenate %142, %147, %135 in 1 : vector<32x16xf32>, vector<32x16xf32>, vector<32x16xf32> -> vector<32x48xf32>
    %cst_66 = arith.constant dense<0.000000e+00> : vector<32x16xf32>
    %149 = tpu.matmul %148, %137, %cst_66 {dimension_numbers = #tpu.dot_dimension_numbers<[1], [0], [0], [1], [0, 0, 1, 1], [], []>} : vector<32x48xf32>, vector<48x16xf32>, vector<32x16xf32> -> vector<32x16xf32>
    %150 = vector.broadcast %117 : vector<1x16xf32> to vector<32x16xf32>
    %151 = arith.addf %149, %150 : vector<32x16xf32>
    %cst_67 = arith.constant 0.000000e+00 : f32
    %152 = vector.broadcast %cst_67 : f32 to vector<32x16xf32>
    %153 = arith.maximumf %151, %152 : vector<32x16xf32>
    %154 = arith.addf %153, %115 : vector<32x16xf32>
    %cst_68 = arith.constant 0.000000e+00 : f32
    %155 = vector.broadcast %cst_68 : f32 to vector<32x16xf32>
    %156 = arith.maximumf %154, %155 : vector<32x16xf32>
    %157 = vector.extract_strided_slice %156 {offsets = [15, 0], sizes = [1, 16], strides = [1, 1]} : vector<32x16xf32> to vector<1x16xf32>
    %158 = vector.extract_strided_slice %156 {offsets = [31, 0], sizes = [1, 16], strides = [1, 1]} : vector<32x16xf32> to vector<1x16xf32>
    %159 = tpu.concatenate %157, %158 in 0 : vector<1x16xf32>, vector<1x16xf32> -> vector<2x16xf32>
    %c0_69 = arith.constant 0 : index
    %c0_70 = arith.constant 0 : index
    %160 = vector.load %arg8[%c0_69, %c0_70] : memref<16x1xf32, #tpu.memory_space<vmem>>, vector<16x1xf32>
    %cst_71 = arith.constant dense<0.000000e+00> : vector<2x1xf32>
    %161 = tpu.matmul %159, %160, %cst_71 {dimension_numbers = #tpu.dot_dimension_numbers<[1], [0], [0], [1], [0, 0, 1, 1], [], []>} : vector<2x16xf32>, vector<16x1xf32>, vector<2x1xf32> -> vector<2x1xf32>
    %c0_72 = arith.constant 0 : index
    %c0_73 = arith.constant 0 : index
    %162 = vector.load %arg9[%c0_72, %c0_73] : memref<1x1xf32, #tpu.memory_space<vmem>>, vector<1x1xf32>
    %163 = vector.broadcast %162 : vector<1x1xf32> to vector<2x1xf32>
    %164 = arith.addf %161, %163 : vector<2x1xf32>
    %c0_74 = arith.constant 0 : index
    %c0_75 = arith.constant 0 : index
    %165 = vector.load %arg10[%c0_74, %c0_75] : memref<2x1xf32, #tpu.memory_space<vmem>>, vector<2x1xf32>
    tpu.vector_store %arg10[%c0_74, %c0_75], %164 {strides = array<i32>} : memref<2x1xf32, #tpu.memory_space<vmem>>, vector<2x1xf32>,
    return
  }
}

</mosaic_0001>

<bundles_post_ra>
// kernel: tpu_custom_call.1
= control target key start
LH: loop header
LB: loop body
LE: loop exit
PB: predicated region body
PF: predicated region fallthrough
CT: control target
= control target key end

     0   :  { %v1831_v0 = vmov 0   ;;  %v41_v8 = vlaneseq  ;;  %vm69_vm0 = vcmask 130048   ;;  %v1832_v12 = vmov 0.0   ;;  %s1833_s15 = smov 32   ;;  %s1834_s20 = smov 16   ;;  %s2399_s0 = inlined_call_operand.vmem [shape: s32[32,1], index: 0, kind: input, shape index: {}]   ;;  %s2400_s1 = inlined_call_operand.vmem [shape: f32[16,16], index: 1, kind: input, shape index: {}]   ;;  %s2401_s2 = inlined_call_operand.vmem [shape: f32[3,48,16], index: 2, kind: input, shape index: {}]   ;;  %s2402_s6 = inlined_call_operand.vmem [shape: f32[16,16], index: 6, kind: input, shape index: {}]   ;;  %s2403_s3 = inlined_call_operand.vmem [shape: f32[3,16], index: 3, kind: input, shape index: {}]   ;;  %s2404_s4 = inlined_call_operand.vmem [shape: f32[3,48,16], index: 4, kind: input, shape index: {}]   ;;  %s2405_s5 = inlined_call_operand.vmem [shape: f32[3,16], index: 5, kind: input, shape index: {}]   ;;  %s2406_s7 = inlined_call_operand.vmem [shape: f32[1,16], index: 7, kind: input, shape index: {}]   ;;  %s2407_s8 = inlined_call_operand.vmem [shape: f32[16,1], index: 8, kind: input, shape index: {}]   ;;  %s2408_s9 = inlined_call_operand.<no memory space> [shape: f32[1,1], index: 9, kind: input, shape index: {}]   ;;  %s2409_s10 = inlined_call_operand.vmem [shape: f32[2,1], index: 10, kind: output, shape index: {}]  }
   0x1   :  { %1830 = vset.pattern.permute.xlu1 %v1831_v0  ;;  %1829 = vset.pattern.permute.xlu0 %v1831_v0  ;;  %v39_v1 = vld [vmem:[%s2399_s0 + $0x10] sm:$0xff]  ;;  %v37_v2 = vld [vmem:[%s2399_s0] sm:$0xff]  ;;  %v68_v4 = vld [vmem:[%s2400_s1 + $0x8] sm:$0xff]  ;;  %vm328_vm10 = vcmask 261120   ;;  %vm337_vm11 = vcmask 392192  }
   0x2   :  { %50 = vperm.xlu1 %1830, %v39_v1   ;;  %44 = vperm.xlu0 %1829, %v37_v2   ;;  %v67_v3 = vld [vmem:[%s2400_s1] sm:$0xff]  ;;  %v40_v5 = vld [vmem:[%s2399_s0 + $0x18] sm:$0xff]  ;;  %v38_v6 = vld [vmem:[%s2399_s0 + $0x8] sm:$0xff]  ;;  %v42_v9 = vand.u32 127, %v41_v8  ;;  %v1936_v28 = vshrl.u32 %v41_v8, 7 }
   0x3   :  { %v1740_v7 = vpack.c.bf16 %v68_v4, %v67_v3  ;;  %v167_v19 = vld [vmem:[%s2401_s2] sm:$0xff]  ;;  %v168_v20 = vld [vmem:[%s2401_s2 + $0x8] sm:$0xff]  ;;  %v169_v22 = vld [vmem:[%s2401_s2 + $0x10] sm:$0xff] }
   0x4   :  { %v1744_v21 = vpack.c.bf16 %v168_v20, %v167_v19  ;;  %v170_v23 = vld [vmem:[%s2401_s2 + $0x18] sm:$0xff]  ;;  %v171_v25 = vld [vmem:[%s2401_s2 + $0x20] sm:$0xff]  ;;  %v172_v26 = vld [vmem:[%s2401_s2 + $0x28] sm:$0xff]  ;;  %vm262_vm5 = vcmp.lt.s32.totalorder %v1936_v28, 2  ;;  %v208_v30 = vadd.s32 16, %v1936_v28  ;;  %vm279_vm6 = vcmp.lt.s32.totalorder %v1936_v28, 1 }
   0x5   :  { %1741 = vmatprep.subr.bf16.mxu0 %v1740_v7  ;;  %v1748_v24 = vpack.c.bf16 %v170_v23, %v169_v22  ;;  %v1752_v27 = vpack.c.bf16 %v172_v26, %v171_v25  ;;  %v1950_v34 = vand.u32 15, %v1936_v28  ;;  %v608_v41 = vld [vmem:[%s2402_s6] sm:$0xff]  ;;  %v609_v42 = vld [vmem:[%s2402_s6 + $0x8] sm:$0xff]  ;;  %vm722_vm13 = vcmp.lt.s32.totalorder %v1936_v28, 4 }
   0x6   :  { %53 = vperm.xlu1 %1830, %v40_v5   ;;  %47 = vperm.xlu0 %1829, %v38_v6   ;;  %v1958_v39 = vand.u32 15, %v208_v30  ;;  %v1768_v46 = vpack.c.bf16 %v609_v42, %v608_v41  ;;  %v191_v22 = vld [vmem:[%s2404_s4 + $0x28] sm:$0xff] }
   0x7   :  { %1743 = vmatpush3.bf16.msra.mxu0 %v1740_v7  ;;  %1745 = vmatprep.subr.bf16.mxu1 %v1744_v21  ;;  %vm284_vm7 = vcmp.ge.s32.totalorder %v1950_v34, 1  ;;  %vm267_vm9 = vcmp.ge.s32.totalorder %v1950_v34, 2  ;;  %vm727_vm14 = vcmp.ge.s32.totalorder %v1950_v34, 4 }
   0x8   :  { %1747 = vmatpush3.bf16.msra.mxu1 %v1744_v21  ;;  %vm286_vm8 = vcmp.ge.s32.totalorder %v1958_v39, 1  ;;  %vm269_vm12 = vcmp.ge.s32.totalorder %v1958_v39, 2  ;;  %v190_v21 = vld [vmem:[%s2404_s4 + $0x20] sm:$0xff]  ;;  %vm729_vm15 = vcmp.ge.s32.totalorder %v1958_v39, 4 }
   0x9   :  { %1749 = vmatprep.subr.bf16.mxu1 %v1748_v24  ;;  %v1764_v23 = vpack.c.bf16 %v191_v22, %v190_v21 }
   0xc   :  { %1751 = vmatpush3.bf16.msra.mxu1 %v1748_v24 }
   0xd   :  { %1753 = vmatprep.subr.bf16.mxu1 %v1752_v27 }
  0x10   :  { %1755 = vmatpush3.bf16.msra.mxu1 %v1752_v27 }
  0x11   :  { %1769 = vmatprep.subr.bf16.mxu1 %v1768_v46 }
  0x81   :  { %v51_v10 = vpop.permute.xlu1 %50  ;;  %v45_v11 = vpop.permute.xlu0 %44 }
  0x82   :  { %vm55_vm1 = vcmp.eq.s32.totalorder %v42_v9, %v45_v11  ;;  %vm57_vm2 = vcmp.eq.s32.totalorder %v42_v9, %v51_v10  ;;  %v186_v11 = vld [vmem:[%s2404_s4] sm:$0xff] }
  0x83   :  { %v1491_v13 = vsel %vm55_vm1, 1.0, %v1832_v12  ;;  %v1493_v16 = vsel %vm57_vm2, 1.0, %v1832_v12  ;;  %vm1836_vm1 = vmmov 0   ;;  %vm1401_vm2 = vcmask 1040384  }
  0x84   :  { %1609 = vmatprep.mubr.msk.f32.mxu0 %vm69_vm0, %v1491_v13  ;;  %v187_v13 = vld [vmem:[%s2404_s4 + $0x8] sm:$0xff] }
  0x85   :  { %v54_v14 = vpop.permute.xlu1 %53  ;;  %v48_v15 = vpop.permute.xlu0 %47 }
  0x86   :  { %vm56_vm3 = vcmp.eq.s32.totalorder %v42_v9, %v48_v15  ;;  %vm58_vm4 = vcmp.eq.s32.totalorder %v42_v9, %v54_v14  ;;  %v335_v14 = vsub.s32 0, %v1936_v28  ;;  %v1756_v15 = vpack.c.bf16 %v187_v13, %v186_v11 }
  0x87   :  { %v1492_v17 = vsel %vm56_vm3, 1.0, %v1832_v12  ;;  %v1494_v18 = vsel %vm58_vm4, 1.0, %v1832_v12  ;;  %vm1485_vm3 = vcmask 1024  }
  0x88   :  { %1610 = vmatmul.mubr.msk.f32.vlgmr.msra.gmra.mrb[0].mxu0 %vm69_vm0, %v1492_v17  ;;  %1757 = vmatprep.subr.bf16.mxu0 %v1756_v15  ;;  %v188_v17 = vld [vmem:[%s2404_s4 + $0x10] sm:$0xff] }
  0x89   :  { %1612 = vmatprep.mubr.msk.f32.mxu0 %vm69_vm0, %v1493_v16  ;;  %v2026_v16 = vld [vmem:[%s2403_s3] sm:$0x7]  ;;  %1759 = vmatpush3.bf16.msra.mxu0 %v1756_v15 }
  0x8a   :  { %v336_v19 = vrot.slane %v2026_v16, %v335_v14 }
  0x8c   :  { %1613 = vmatmul.mubr.msk.f32.gmra.mrb[2].mxu0 %vm69_vm0, %v1494_v18  ;;  %v189_v18 = vld [vmem:[%s2404_s4 + $0x18] sm:$0xff] }
  0x8d   :  { %v1760_v20 = vpack.c.bf16 %v189_v18, %v188_v17  ;;  %v2098_v18 = vld [vmem:[%s2405_s5] sm:$0x7] }
  0x8e   :  { %v506_v21 = vrot.slane %v2098_v18, %v335_v14  ;;  %v177_v14 = vld [vmem:[%s2401_s2 + $0x50] sm:$0xff] }
  0x8f   :  { %1761 = vmatprep.subr.bf16.mxu0 %v1760_v20 }
  0x90   :  { %1763 = vmatpush3.bf16.msra.mxu0 %v1760_v20  ;;  %v174_v20 = vld [vmem:[%s2401_s2 + $0x38] sm:$0xff] }
  0x91   :  { %1765 = vmatprep.subr.bf16.mxu0 %v1764_v23 }
  0x94   :  { %1767 = vmatpush3.bf16.msra.mxu0 %v1764_v23  ;;  %v1507_v23 = vld [vmem:[%s2406_s7] ss:$0 sm:$0xff] }
 0x15b   :  { %v1939_v29 = vpop.f32.mrb[0].mxu0 }
 0x15c   :  { %v259_v31 = vrot.slane %v1939_v29, 6  ;;  %v276_v32 = vrot.slane %v1939_v29, 7  ;;  %314 = vrot.lane.b32.xlu1 %v1939_v29, %s1833_s15  ;;  %v1946_v33 = vpop.f32.mrb[1].mxu0 }
 0x15d   :  { %v258_v35 = vrot.slane %v1946_v33, 6  ;;  %v275_v36 = vrot.slane %v1946_v33, 7  ;;  %312 = vrot.lane.b32.xlu0 %v1946_v33, %s1833_s15 }
 0x15f   :  { %v1614_v37 = vpop.f32.mrb[2].mxu0  ;;  %v282_v38 = vsel %vm279_vm6, %v275_v36, %v276_v32  ;;  %v265_v40 = vsel %vm262_vm5, %v258_v35, %v259_v31 }
 0x160   :  { %v261_v43 = vrot.slane %v1614_v37, 6  ;;  %v278_v44 = vrot.slane %v1614_v37, 7  ;;  %298 = vrot.lane.b32.xlu1 %v282_v38, %s1834_s20  ;;  %v158_v45 = vpop.f32.mrb[3].mxu0 }
 0x161   :  { %v260_v47 = vrot.slane %v158_v45, 6  ;;  %v277_v48 = vrot.slane %v158_v45, 7 }
 0x162   :  { %v283_v49 = vsel %vm279_vm6, %v278_v44, %v275_v36  ;;  %v266_v50 = vsel %vm262_vm5, %v261_v43, %v258_v35 }
 0x163   :  { %v288_v51 = vsel %vm284_vm7, %v283_v49, 0.0  ;;  %v280_v52 = vsel %vm279_vm6, %v277_v48, %v278_v44  ;;  %v281_v53 = vsel %vm279_vm6, %v276_v32, %v277_v48  ;;  %v263_v54 = vsel %vm262_vm5, %v260_v47, %v261_v43 }
 0x164   :  { %296 = vrot.lane.b32.xlu0 %v288_v51, %s1834_s20  ;;  %302 = vrot.lane.b32.xlu1 %v280_v52, %s1834_s20  ;;  %v264_v55 = vsel %vm262_vm5, %v259_v31, %v260_v47  ;;  %v290_v56 = vsel %vm286_vm8, %v281_v53, 0.0  ;;  %v271_v62 = vsel %vm267_vm9, %v266_v50, 0.0 }
 0x165   :  { %v273_v4 = vsel %vm269_vm12, %v264_v55, 0.0 }
 0x168   :  { %300 = vrot.lane.b32.xlu0 %v290_v56, %s1834_s20  ;;  %318 = vrot.lane.b32.xlu1 %v1614_v37, %s1833_s15 }
 0x16c   :  { %316 = vrot.lane.b32.xlu0 %v158_v45, %s1833_s15 }
 0x1ce   :  { %v315_v57 = vpop.permute.xlu1 %314 }
 0x1cf   :  { %v313_v58 = vpop.permute.xlu0 %312 }
 0x1d2   :  { %v299_v59 = vpop.permute.xlu1 %298 }
 0x1d3   :  { %v325_v60 = vsel %vm69_vm0, %v265_v40, %v299_v59 }
 0x1d4   :  { %v330_v2 = vsel %vm328_vm10, %v325_v60, %v315_v57 }
 0x1d6   :  { %v297_v61 = vpop.permute.xlu0 %296  ;;  %v303_v0 = vpop.permute.xlu1 %302 }
 0x1d7   :  { %v324_v63 = vsel %vm69_vm0, %v271_v62, %v297_v61  ;;  %v327_v8 = vsel %vm69_vm0, %v263_v54, %v303_v0 }
 0x1d8   :  { %v329_v1 = vsel %vm328_vm10, %v324_v63, %v313_v58 }
 0x1d9   :  { %1627 = vmatprep.mubr.msk.f32.mxu1 %vm337_vm11, %v329_v1 }
 0x1da   :  { %1628 = vmatmul.mubr.msk.f32.vlgmr.msra.gmra.mrb[0].mxu1 %vm337_vm11, %v330_v2  ;;  %v301_v3 = vpop.permute.xlu0 %300  ;;  %v319_v5 = vpop.permute.xlu1 %318 }
 0x1db   :  { %1771 = vmatpush3.bf16.msra.mxu1 %v1768_v46  ;;  %v326_v6 = vsel %vm69_vm0, %v273_v4, %v301_v3  ;;  %v332_v10 = vsel %vm328_vm10, %v327_v8, %v319_v5 }
 0x1de   :  { %v317_v7 = vpop.permute.xlu0 %316 }
 0x1df   :  { %v331_v9 = vsel %vm328_vm10, %v326_v6, %v317_v7 }
 0x1e0   :  { %1630 = vmatprep.mubr.msk.f32.mxu1 %vm337_vm11, %v331_v9 }
 0x1e1   :  { %1631 = vmatmul.mubr.msk.f32.gmra.mrb[2].mxu1 %vm337_vm11, %v332_v10 }
 0x1e2   :  { %1655 = vmatprep.mubr.msk.f32.mxu1 %vm69_vm0, %v1946_v33 }
 0x1e5   :  { %1656 = vmatmul.mubr.msk.f32.vlgmr.msra.gmra.mrb[4].mxu1 %vm69_vm0, %v1939_v29 }
 0x1e6   :  { %1658 = vmatprep.mubr.msk.f32.mxu1 %vm69_vm0, %v158_v45 }
 0x1e9   :  { %1659 = vmatmul.mubr.msk.f32.gmra.mrb[6].mxu1 %vm69_vm0, %v1614_v37 }
 0x2ad   :  { %v1629_v24 = vpop.f32.mrb[0].mxu1 }
 0x2ae   :  { %v422_v25 = vadd.f32 %v1629_v24, %v336_v19  ;;  %v416_v26 = vpop.f32.mrb[1].mxu1 }
 0x2af   :  { %v417_v27 = vadd.f32 %v416_v26, %v336_v19  ;;  %v176_v26 = vld [vmem:[%s2401_s2 + $0x48] sm:$0xff] }
 0x2b0   :  { %v436_v29 = vmax.f32 %v422_v25, 0.0  ;;  %v175_v25 = vld [vmem:[%s2401_s2 + $0x40] sm:$0xff] }
 0x2b1   :  { %v435_v30 = vmax.f32 %v417_v27, 0.0 }
 0x2b2   :  { %v440_v31 = vrot.slane %v436_v29, 6  ;;  %v452_v32 = vrot.slane %v436_v29, 7  ;;  %485 = vrot.lane.b32.xlu1 %v436_v29, %s1833_s15 }
 0x2b3   :  { %v439_v33 = vrot.slane %v435_v30, 6  ;;  %v451_v35 = vrot.slane %v435_v30, 7  ;;  %483 = vrot.lane.b32.xlu0 %v435_v30, %s1833_s15  ;;  %v1776_v30 = vpack.c.bf16 %v176_v26, %v175_v25 }
 0x2b4   :  { %v1632_v36 = vpop.f32.mrb[2].mxu1 }
 0x2b5   :  { %v432_v37 = vadd.f32 %v1632_v36, %v336_v19  ;;  %v426_v38 = vpop.f32.mrb[3].mxu1  ;;  %v457_v40 = vsel %vm279_vm6, %v451_v35, %v452_v32  ;;  %v445_v41 = vsel %vm262_vm5, %v439_v33, %v440_v31 }
 0x2b6   :  { %v427_v42 = vadd.f32 %v426_v38, %v336_v19  ;;  %469 = vrot.lane.b32.xlu1 %v457_v40, %s1834_s20  ;;  %v173_v19 = vld [vmem:[%s2401_s2 + $0x30] sm:$0xff] }
 0x2b7   :  { %v438_v43 = vmax.f32 %v432_v37, 0.0  ;;  %v1772_v22 = vpack.c.bf16 %v174_v20, %v173_v19 }
 0x2b8   :  { %v437_v44 = vmax.f32 %v427_v42, 0.0  ;;  %v2050_v45 = vpop.f32.mrb[4].mxu1 }
 0x2b9   :  { %v442_v46 = vrot.slane %v438_v43, 6  ;;  %v454_v47 = vrot.slane %v438_v43, 7  ;;  %v2052_v48 = vpop.f32.mrb[5].mxu1  ;;  %1773 = vmatprep.subr.bf16.mxu0 %v1772_v22 }
 0x2ba   :  { %v441_v49 = vrot.slane %v437_v44, 6  ;;  %v453_v50 = vrot.slane %v437_v44, 7  ;;  %v692_v37 = vadd.f32 %v1507_v23, %v2052_v48 }
 0x2bb   :  { %v458_v51 = vsel %vm279_vm6, %v454_v47, %v451_v35  ;;  %v446_v52 = vsel %vm262_vm5, %v442_v46, %v439_v33  ;;  %v697_v35 = vadd.f32 %v2050_v45, %v1507_v23 }
 0x2bc   :  { %v2058_v53 = vpop.f32.mrb[6].mxu1  ;;  %v459_v54 = vsel %vm284_vm7, %v458_v51, 0.0  ;;  %v455_v55 = vsel %vm279_vm6, %v453_v50, %v454_v47  ;;  %v456_v56 = vsel %vm279_vm6, %v452_v32, %v453_v50  ;;  %v443_v58 = vsel %vm262_vm5, %v441_v49, %v442_v46 }
 0x2bd   :  { %467 = vrot.lane.b32.xlu0 %v459_v54, %s1834_s20  ;;  %v2067_v57 = vpop.f32.mrb[7].mxu1  ;;  %473 = vrot.lane.b32.xlu1 %v455_v55, %s1834_s20  ;;  %v444_v59 = vsel %vm262_vm5, %v440_v31, %v441_v49  ;;  %v461_v60 = vsel %vm286_vm8, %v456_v56, 0.0  ;;  %v447_v2 = vsel %vm267_vm9, %v446_v52, 0.0  ;;  %v178_v31 = vld [vmem:[%s2401_s2 + $0x58] sm:$0xff]  ;;  %v707_v48 = vadd.f32 %v2058_v53, %v1507_v23 }
 0x2be   :  { %v449_v8 = vsel %vm269_vm12, %v444_v59, 0.0  ;;  %v1780_v33 = vpack.c.bf16 %v178_v31, %v177_v14  ;;  %v702_v52 = vadd.f32 %v1507_v23, %v2067_v57 }
 0x2c1   :  { %471 = vrot.lane.b32.xlu0 %v461_v60, %s1834_s20  ;;  %489 = vrot.lane.b32.xlu1 %v438_v43, %s1833_s15 }
 0x2c5   :  { %487 = vrot.lane.b32.xlu0 %v437_v44, %s1833_s15 }
 0x324   :  { %v486_v61 = vpop.permute.xlu1 %485 }
 0x325   :  { %v484_v62 = vpop.permute.xlu0 %483 }
 0x328   :  { %v470_v63 = vpop.permute.xlu1 %469 }
 0x329   :  { %v496_v0 = vsel %vm69_vm0, %v445_v41, %v470_v63 }
 0x32a   :  { %v500_v6 = vsel %vm328_vm10, %v496_v0, %v486_v61 }
 0x32f   :  { %v468_v1 = vpop.permute.xlu0 %467  ;;  %v474_v4 = vpop.permute.xlu1 %473 }
 0x330   :  { %v495_v3 = vsel %vm69_vm0, %v447_v2, %v468_v1  ;;  %v498_v13 = vsel %vm69_vm0, %v443_v58, %v474_v4 }
 0x331   :  { %v499_v5 = vsel %vm328_vm10, %v495_v3, %v484_v62 }
 0x332   :  { %1645 = vmatprep.mubr.msk.f32.mxu0 %vm337_vm11, %v499_v5 }
 0x333   :  { %1646 = vmatmul.mubr.msk.f32.vlgmr.msra.gmra.mrb[4].mxu0 %vm337_vm11, %v500_v6  ;;  %v472_v7 = vpop.permute.xlu0 %471  ;;  %v490_v9 = vpop.permute.xlu1 %489 }
 0x334   :  { %v497_v10 = vsel %vm69_vm0, %v449_v8, %v472_v7  ;;  %v502_v17 = vsel %vm328_vm10, %v498_v13, %v490_v9  ;;  %1775 = vmatpush3.bf16.msra.mxu0 %v1772_v22 }
 0x335   :  { %1777 = vmatprep.subr.bf16.mxu0 %v1776_v30 }
 0x337   :  { %v488_v11 = vpop.permute.xlu0 %487 }
 0x338   :  { %v501_v15 = vsel %vm328_vm10, %v497_v10, %v488_v11  ;;  %1779 = vmatpush3.bf16.msra.mxu0 %v1776_v30 }
 0x339   :  { %1648 = vmatprep.mubr.msk.f32.mxu0 %vm337_vm11, %v501_v15  ;;  %1781 = vmatprep.subr.bf16.mxu0 %v1780_v33 }
 0x33a   :  { %1649 = vmatmul.mubr.msk.f32.gmra.mrb[6].mxu0 %vm337_vm11, %v502_v17 }
 0x33c   :  { %1783 = vmatpush3.bf16.msra.mxu0 %v1780_v33  ;;  %v193_v33 = vld [vmem:[%s2404_s4 + $0x38] sm:$0xff] }
 0x406   :  { %v1647_v24 = vpop.f32.mrb[4].mxu0 }
 0x407   :  { %v591_v27 = vadd.f32 %v1647_v24, %v506_v21  ;;  %v585_v29 = vpop.f32.mrb[5].mxu0 }
 0x408   :  { %v586_v32 = vadd.f32 %v585_v29, %v506_v21 }
 0x409   :  { %v605_v36 = vmax.f32 %v591_v27, 0.0 }
 0x40a   :  { %v604_v38 = vmax.f32 %v586_v32, 0.0  ;;  %v192_v32 = vld [vmem:[%s2404_s4 + $0x30] sm:$0xff] }
 0x40b   :  { %v711_v40 = vadd.f32 %v697_v35, %v605_v36  ;;  %v789_v35 = vsub.s32 1, %v1936_v28  ;;  %v1784_v36 = vpack.c.bf16 %v193_v33, %v192_v32 }
 0x40c   :  { %v710_v41 = vadd.f32 %v692_v37, %v604_v38  ;;  %v194_v37 = vld [vmem:[%s2404_s4 + $0x40] sm:$0xff]  ;;  %v195_v38 = vld [vmem:[%s2404_s4 + $0x48] sm:$0xff] }
 0x40d   :  { %v2126_v42 = vmax.f32 %v711_v40, 0.0  ;;  %v1650_v43 = vpop.f32.mrb[6].mxu0  ;;  %1785 = vmatprep.subr.bf16.mxu1 %v1784_v36  ;;  %v790_v40 = vrot.slane %v2026_v16, %v789_v35 }
 0x40e   :  { %v2128_v44 = vmax.f32 %v710_v41, 0.0  ;;  %v601_v46 = vadd.f32 %v1650_v43, %v506_v21  ;;  %v595_v47 = vpop.f32.mrb[7].mxu0  ;;  %1787 = vmatpush3.bf16.msra.mxu1 %v1784_v36  ;;  %v1788_v41 = vpack.c.bf16 %v195_v38, %v194_v37  ;;  %v196_v43 = vld [vmem:[%s2404_s4 + $0x50] sm:$0xff] }
 0x40f   :  { %v596_v49 = vadd.f32 %v595_v47, %v506_v21  ;;  %769 = vrot.lane.b32.xlu1 %v2126_v42, %s1833_s15  ;;  %v736_v45 = vrot.slane %v2126_v42, 6  ;;  %v719_v5 = vrot.slane %v2126_v42, 4 }
 0x410   :  { %v607_v50 = vmax.f32 %v601_v46, 0.0  ;;  %767 = vrot.lane.b32.xlu0 %v2128_v44, %s1833_s15  ;;  %v735_v51 = vrot.slane %v2128_v44, 6  ;;  %v718_v4 = vrot.slane %v2128_v44, 4  ;;  %v197_v46 = vld [vmem:[%s2404_s4 + $0x58] sm:$0xff]  ;;  %1789 = vmatprep.subr.bf16.mxu1 %v1788_v41 }
 0x411   :  { %v606_v54 = vmax.f32 %v596_v49, 0.0  ;;  %v1792_v47 = vpack.c.bf16 %v197_v46, %v196_v43  ;;  %v959_v43 = vrot.slane %v2098_v18, %v789_v35  ;;  %v184_v35 = vld [vmem:[%s2401_s2 + $0x88] sm:$0xff] }
 0x412   :  { %v713_v55 = vadd.f32 %v707_v48, %v607_v50  ;;  %v741_v56 = vsel %vm262_vm5, %v735_v51, %v736_v45  ;;  %v725_v9 = vsel %vm722_vm13, %v718_v4, %v719_v5  ;;  %1791 = vmatpush3.bf16.msra.mxu1 %v1788_v41  ;;  %v180_v41 = vld [vmem:[%s2401_s2 + $0x68] sm:$0xff] }
 0x413   :  { %v712_v58 = vadd.f32 %v702_v52, %v606_v54  ;;  %753 = vrot.lane.b32.xlu1 %v741_v56, %s1834_s20  ;;  %1793 = vmatprep.subr.bf16.mxu1 %v1792_v47 }
 0x414   :  { %v2141_v59 = vmax.f32 %v713_v55, 0.0 }
 0x415   :  { %v2143_v60 = vmax.f32 %v712_v58, 0.0 }
 0x416   :  { %v738_v53 = vrot.slane %v2141_v59, 6  ;;  %v721_v3 = vrot.slane %v2141_v59, 4  ;;  %1795 = vmatpush3.bf16.msra.mxu1 %v1792_v47 }
 0x417   :  { %v737_v61 = vrot.slane %v2143_v60, 6  ;;  %v720_v15 = vrot.slane %v2143_v60, 4 }
 0x418   :  { %v742_v62 = vsel %vm262_vm5, %v738_v53, %v735_v51  ;;  %v726_v8 = vsel %vm722_vm13, %v721_v3, %v718_v4 }
 0x419   :  { %v743_v57 = vsel %vm267_vm9, %v742_v62, 0.0  ;;  %v739_v63 = vsel %vm262_vm5, %v737_v61, %v738_v53  ;;  %v740_v0 = vsel %vm262_vm5, %v736_v45, %v737_v61  ;;  %v731_v13 = vsel %vm727_vm14, %v726_v8, 0.0 }
 0x41a   :  { %751 = vrot.lane.b32.xlu0 %v743_v57, %s1834_s20  ;;  %757 = vrot.lane.b32.xlu1 %v739_v63, %s1834_s20  ;;  %v745_v1 = vsel %vm269_vm12, %v740_v0, 0.0  ;;  %v724_v23 = vsel %vm722_vm13, %v719_v5, %v720_v15  ;;  %v723_v26 = vsel %vm722_vm13, %v720_v15, %v721_v3 }
 0x41b   :  { %v733_v24 = vsel %vm729_vm15, %v724_v23, 0.0 }
 0x41e   :  { %755 = vrot.lane.b32.xlu0 %v745_v1, %s1834_s20  ;;  %773 = vrot.lane.b32.xlu1 %v2141_v59, %s1833_s15 }
 0x422   :  { %771 = vrot.lane.b32.xlu0 %v2143_v60, %s1833_s15 }
 0x481   :  { %v770_v2 = vpop.permute.xlu1 %769 }
 0x482   :  { %v768_v6 = vpop.permute.xlu0 %767 }
 0x485   :  { %v754_v7 = vpop.permute.xlu1 %753 }
 0x486   :  { %v780_v10 = vsel %vm69_vm0, %v725_v9, %v754_v7 }
 0x487   :  { %v784_v21 = vsel %vm328_vm10, %v780_v10, %v770_v2 }
 0x48c   :  { %v752_v11 = vpop.permute.xlu0 %751  ;;  %v758_v19 = vpop.permute.xlu1 %757 }
 0x48d   :  { %v779_v17 = vsel %vm69_vm0, %v731_v13, %v752_v11  ;;  %v782_v30 = vsel %vm69_vm0, %v723_v26, %v758_v19 }
 0x48e   :  { %v783_v20 = vsel %vm328_vm10, %v779_v17, %v768_v6 }
 0x48f   :  { %1673 = vmatprep.mubr.msk.f32.mxu0 %vm337_vm11, %v783_v20 }
 0x490   :  { %1674 = vmatmul.mubr.msk.f32.vlgmr.msra.gmra.mrb[8].mxu0 %vm337_vm11, %v784_v21  ;;  %v756_v22 = vpop.permute.xlu0 %755  ;;  %v774_v25 = vpop.permute.xlu1 %773 }
 0x491   :  { %v781_v27 = vsel %vm69_vm0, %v733_v24, %v756_v22  ;;  %v786_v31 = vsel %vm328_vm10, %v782_v30, %v774_v25 }
 0x494   :  { %v772_v29 = vpop.permute.xlu0 %771 }
 0x495   :  { %v785_v14 = vsel %vm328_vm10, %v781_v27, %v772_v29 }
 0x496   :  { %1676 = vmatprep.mubr.msk.f32.mxu0 %vm337_vm11, %v785_v14 }
 0x497   :  { %1677 = vmatmul.mubr.msk.f32.gmra.mrb[10].mxu0 %vm337_vm11, %v786_v31 }
 0x563   :  { %v1675_v49 = vpop.f32.mrb[8].mxu0 }
 0x564   :  { %v875_v45 = vadd.f32 %v1675_v49, %v790_v40  ;;  %v869_v48 = vpop.f32.mrb[9].mxu0  ;;  %v181_v49 = vld [vmem:[%s2401_s2 + $0x70] sm:$0xff] }
 0x565   :  { %v870_v50 = vadd.f32 %v869_v48, %v790_v40 }
 0x566   :  { %v889_v51 = vmax.f32 %v875_v45, 0.0  ;;  %v182_v45 = vld [vmem:[%s2401_s2 + $0x78] sm:$0xff] }
 0x567   :  { %v888_v52 = vmax.f32 %v870_v50, 0.0 }
 0x568   :  { %v893_v54 = vrot.slane %v889_v51, 4  ;;  %v905_v55 = vrot.slane %v889_v51, 6  ;;  %938 = vrot.lane.b32.xlu1 %v889_v51, %s1833_s15  ;;  %v1800_v51 = vpack.c.bf16 %v182_v45, %v181_v49  ;;  %v202_v45 = vld [vmem:[%s2404_s4 + $0x80] sm:$0xff] }
 0x569   :  { %v892_v56 = vrot.slane %v888_v52, 4  ;;  %v904_v58 = vrot.slane %v888_v52, 6  ;;  %936 = vrot.lane.b32.xlu0 %v888_v52, %s1833_s15  ;;  %v183_v52 = vld [vmem:[%s2401_s2 + $0x80] sm:$0xff] }
 0x56a   :  { %v1678_v53 = vpop.f32.mrb[10].mxu0 }
 0x56b   :  { %v885_v61 = vadd.f32 %v1678_v53, %v790_v40  ;;  %v879_v62 = vpop.f32.mrb[11].mxu0  ;;  %v910_v57 = vsel %vm262_vm5, %v904_v58, %v905_v55  ;;  %v898_v63 = vsel %vm722_vm13, %v892_v56, %v893_v54 }
 0x56c   :  { %v880_v0 = vadd.f32 %v879_v62, %v790_v40  ;;  %922 = vrot.lane.b32.xlu1 %v910_v57, %s1834_s20  ;;  %v179_v40 = vld [vmem:[%s2401_s2 + $0x60] sm:$0xff] }
 0x56d   :  { %v891_v1 = vmax.f32 %v885_v61, 0.0  ;;  %v1796_v46 = vpack.c.bf16 %v180_v41, %v179_v40  ;;  %v1131_v40 = vsub.s32 2, %v1936_v28 }
 0x56e   :  { %v890_v2 = vmax.f32 %v880_v0, 0.0 }
 0x56f   :  { %v895_v3 = vrot.slane %v891_v1, 4  ;;  %v907_v4 = vrot.slane %v891_v1, 6  ;;  %1797 = vmatprep.subr.bf16.mxu0 %v1796_v46 }
 0x570   :  { %v894_v5 = vrot.slane %v890_v2, 4  ;;  %v906_v6 = vrot.slane %v890_v2, 6  ;;  %1799 = vmatpush3.bf16.msra.mxu0 %v1796_v46  ;;  %v201_v46 = vld [vmem:[%s2404_s4 + $0x78] sm:$0xff] }
 0x571   :  { %v911_v7 = vsel %vm262_vm5, %v907_v4, %v904_v58  ;;  %v899_v8 = vsel %vm722_vm13, %v895_v3, %v892_v56  ;;  %1801 = vmatprep.subr.bf16.mxu0 %v1800_v51 }
 0x572   :  { %v912_v9 = vsel %vm267_vm9, %v911_v7, 0.0  ;;  %v908_v10 = vsel %vm262_vm5, %v906_v6, %v907_v4  ;;  %v909_v11 = vsel %vm262_vm5, %v905_v55, %v906_v6  ;;  %v896_v13 = vsel %vm722_vm13, %v894_v5, %v895_v3 }
 0x573   :  { %920 = vrot.lane.b32.xlu0 %v912_v9, %s1834_s20  ;;  %926 = vrot.lane.b32.xlu1 %v908_v10, %s1834_s20  ;;  %v897_v15 = vsel %vm722_vm13, %v893_v54, %v894_v5  ;;  %v914_v17 = vsel %vm269_vm12, %v909_v11, 0.0  ;;  %v900_v24 = vsel %vm727_vm14, %v899_v8, 0.0  ;;  %v1804_v55 = vpack.c.bf16 %v184_v35, %v183_v52 }
 0x574   :  { %v902_v14 = vsel %vm729_vm15, %v897_v15, 0.0  ;;  %1803 = vmatpush3.bf16.msra.mxu0 %v1800_v51 }
 0x575   :  { %1805 = vmatprep.subr.bf16.mxu0 %v1804_v55 }
 0x577   :  { %924 = vrot.lane.b32.xlu0 %v914_v17, %s1834_s20  ;;  %942 = vrot.lane.b32.xlu1 %v891_v1, %s1833_s15 }
 0x578   :  { %1807 = vmatpush3.bf16.msra.mxu0 %v1804_v55 }
 0x57b   :  { %940 = vrot.lane.b32.xlu0 %v890_v2, %s1833_s15 }
 0x5da   :  { %v939_v19 = vpop.permute.xlu1 %938 }
 0x5db   :  { %v937_v20 = vpop.permute.xlu0 %936 }
 0x5de   :  { %v923_v21 = vpop.permute.xlu1 %922 }
 0x5df   :  { %v949_v22 = vsel %vm69_vm0, %v898_v63, %v923_v21 }
 0x5e0   :  { %v953_v29 = vsel %vm328_vm10, %v949_v22, %v939_v19 }
 0x5e5   :  { %v921_v23 = vpop.permute.xlu0 %920  ;;  %v927_v26 = vpop.permute.xlu1 %926 }
 0x5e6   :  { %v948_v25 = vsel %vm69_vm0, %v900_v24, %v921_v23  ;;  %v951_v36 = vsel %vm69_vm0, %v896_v13, %v927_v26 }
 0x5e7   :  { %v952_v27 = vsel %vm328_vm10, %v948_v25, %v937_v20 }
 0x5e8   :  { %1691 = vmatprep.mubr.msk.f32.mxu1 %vm337_vm11, %v952_v27 }
 0x5e9   :  { %1692 = vmatmul.mubr.msk.f32.vlgmr.msra.gmra.mrb[8].mxu1 %vm337_vm11, %v953_v29  ;;  %v925_v30 = vpop.permute.xlu0 %924  ;;  %v943_v31 = vpop.permute.xlu1 %942 }
 0x5ea   :  { %v950_v32 = vsel %vm69_vm0, %v902_v14, %v925_v30  ;;  %v955_v38 = vsel %vm328_vm10, %v951_v36, %v943_v31 }
 0x5ed   :  { %v941_v33 = vpop.permute.xlu0 %940 }
 0x5ee   :  { %v954_v37 = vsel %vm328_vm10, %v950_v32, %v941_v33 }
 0x5ef   :  { %1694 = vmatprep.mubr.msk.f32.mxu1 %vm337_vm11, %v954_v37  ;;  %v198_v37 = vld [vmem:[%s2404_s4 + $0x60] sm:$0xff] }
 0x5f0   :  { %1695 = vmatmul.mubr.msk.f32.gmra.mrb[10].mxu1 %vm337_vm11, %v955_v38  ;;  %v199_v38 = vld [vmem:[%s2404_s4 + $0x68] sm:$0xff] }
 0x5f1   :  { %v1808_v41 = vpack.c.bf16 %v199_v38, %v198_v37 }
 0x5f3   :  { %1809 = vmatprep.subr.bf16.mxu1 %v1808_v41 }
 0x5f4   :  { %1811 = vmatpush3.bf16.msra.mxu1 %v1808_v41 }
 0x6bc   :  { %v1693_v47 = vpop.f32.mrb[8].mxu1 }
 0x6bd   :  { %v1044_v48 = vadd.f32 %v1693_v47, %v959_v43  ;;  %v1038_v50 = vpop.f32.mrb[9].mxu1  ;;  %v1132_v47 = vrot.slane %v2026_v16, %v1131_v40 }
 0x6be   :  { %v1039_v54 = vadd.f32 %v1038_v50, %v959_v43 }
 0x6bf   :  { %v1058_v56 = vmax.f32 %v1044_v48, 0.0  ;;  %v203_v48 = vld [vmem:[%s2404_s4 + $0x88] sm:$0xff] }
 0x6c0   :  { %v1057_v58 = vmax.f32 %v1039_v54, 0.0  ;;  %v1816_v50 = vpack.c.bf16 %v203_v48, %v202_v45 }
 0x6c1   :  { %v1062_v53 = vadd.f32 %v1058_v56, %v2126_v42 }
 0x6c2   :  { %v1061_v61 = vadd.f32 %v1057_v58, %v2128_v44 }
 0x6c3   :  { %v2284_v62 = vmax.f32 %v1062_v53, 0.0  ;;  %v1696_v57 = vpop.f32.mrb[10].mxu1 }
 0x6c4   :  { %v1065_v63 = vmax.f32 %v1061_v61, 0.0  ;;  %v1054_v0 = vadd.f32 %v1696_v57, %v959_v43  ;;  %v1048_v1 = vpop.f32.mrb[11].mxu1 }
 0x6c5   :  { %v1049_v2 = vadd.f32 %v1048_v1, %v959_v43  ;;  %1111 = vrot.lane.b32.xlu1 %v2284_v62, %s1833_s15  ;;  %v1078_v3 = vrot.slane %v2284_v62, 4  ;;  %v200_v43 = vld [vmem:[%s2404_s4 + $0x70] sm:$0xff] }
 0x6c6   :  { %v1060_v4 = vmax.f32 %v1054_v0, 0.0  ;;  %1109 = vrot.lane.b32.xlu0 %v1065_v63, %s1833_s15  ;;  %v1077_v42 = vrot.slane %v1065_v63, 4  ;;  %v1812_v49 = vpack.c.bf16 %v201_v46, %v200_v43 }
 0x6c7   :  { %v1059_v5 = vmax.f32 %v1049_v2, 0.0 }
 0x6c8   :  { %v1064_v44 = vadd.f32 %v1060_v4, %v2141_v59  ;;  %v1083_v6 = vsel %vm722_vm13, %v1077_v42, %v1078_v3  ;;  %1813 = vmatprep.subr.bf16.mxu1 %v1812_v49 }
 0x6c9   :  { %v1063_v7 = vadd.f32 %v1059_v5, %v2143_v60  ;;  %1095 = vrot.lane.b32.xlu1 %v1083_v6, %s1834_s20  ;;  %1815 = vmatpush3.bf16.msra.mxu1 %v1812_v49 }
 0x6ca   :  { %v2295_v8 = vmax.f32 %v1064_v44, 0.0  ;;  %1817 = vmatprep.subr.bf16.mxu1 %v1816_v50 }
 0x6cb   :  { %v1067_v9 = vmax.f32 %v1063_v7, 0.0 }
 0x6cc   :  { %v1080_v10 = vrot.slane %v2295_v8, 4 }
 0x6cd   :  { %v1079_v11 = vrot.slane %v1067_v9, 4  ;;  %1819 = vmatpush3.bf16.msra.mxu1 %v1816_v50 }
 0x6ce   :  { %v1084_v13 = vsel %vm722_vm13, %v1080_v10, %v1077_v42 }
 0x6cf   :  { %v1085_v15 = vsel %vm727_vm14, %v1084_v13, 0.0  ;;  %v1081_v59 = vsel %vm722_vm13, %v1079_v11, %v1080_v10  ;;  %v1082_v60 = vsel %vm722_vm13, %v1078_v3, %v1079_v11 }
 0x6d0   :  { %1093 = vrot.lane.b32.xlu0 %v1085_v15, %s1834_s20  ;;  %1099 = vrot.lane.b32.xlu1 %v1081_v59, %s1834_s20  ;;  %v1087_v17 = vsel %vm729_vm15, %v1082_v60, 0.0 }
 0x6d4   :  { %1097 = vrot.lane.b32.xlu0 %v1087_v17, %s1834_s20  ;;  %1115 = vrot.lane.b32.xlu1 %v2295_v8, %s1833_s15 }
 0x6d8   :  { %1113 = vrot.lane.b32.xlu0 %v1067_v9, %s1833_s15 }
 0x737   :  { %v1112_v19 = vpop.permute.xlu1 %1111 }
 0x738   :  { %v1110_v20 = vpop.permute.xlu0 %1109 }
 0x73b   :  { %v1096_v21 = vpop.permute.xlu1 %1095 }
 0x73c   :  { %v1122_v22 = vsel %vm69_vm0, %v1065_v63, %v1096_v21 }
 0x73d   :  { %v1126_v27 = vsel %vm328_vm10, %v1122_v22, %v1112_v19 }
 0x742   :  { %v1094_v23 = vpop.permute.xlu0 %1093  ;;  %v1100_v25 = vpop.permute.xlu1 %1099 }
 0x743   :  { %v1121_v24 = vsel %vm69_vm0, 0.0, %v1094_v23  ;;  %v1124_v32 = vsel %vm69_vm0, %v1067_v9, %v1100_v25  ;;  %v1403_v25 = vld [vmem:[%s2407_s8] sm:$0xff] }
 0x744   :  { %v1125_v26 = vsel %vm328_vm10, %v1121_v24, %v1110_v20 }
 0x745   :  { %1709 = vmatprep.mubr.msk.f32.mxu0 %vm337_vm11, %v1125_v26  ;;  %v1404_v26 = vld [vmem:[%s2407_s8 + $0x8] sm:$0xff] }
 0x746   :  { %1710 = vmatmul.mubr.msk.f32.vlgmr.msra.gmra.mrb[12].mxu0 %vm337_vm11, %v1126_v27  ;;  %v1098_v29 = vpop.permute.xlu0 %1097  ;;  %v1116_v30 = vpop.permute.xlu1 %1115  ;;  %v1821_v27 = vpack.c.bf16 %v1404_v26, %v1403_v25 }
 0x747   :  { %v1123_v14 = vsel %vm69_vm0, 0.0, %v1098_v29  ;;  %v1128_v36 = vsel %vm328_vm10, %v1124_v32, %v1116_v30  ;;  %v1835_v29 = vmov 0.0|0.0   ;;  %v15_v30 = vstv %s2408_s9 }
 0x748   :  { %1820 = vmatprep.subr.bf16.mxu0 %v1835_v29  ;;  %16 = vst [vmem:[#allocation2] sm:$0x1] %v15_v30 }
 0x749   :  { %1822 = vmatpush3.bf16.msra.mxu0 %v1821_v27 }
 0x74a   :  { %v1114_v31 = vpop.permute.xlu0 %1113 }
 0x74b   :  { %v1127_v33 = vsel %vm328_vm10, %v1123_v14, %v1114_v31  ;;  %v1293_v14 = vrot.slane %v2098_v18, %v1131_v40 }
 0x74c   :  { %1712 = vmatprep.mubr.msk.f32.mxu0 %vm337_vm11, %v1127_v33 }
 0x74d   :  { %1713 = vmatmul.mubr.msk.f32.gmra.mrb[14].mxu0 %vm337_vm11, %v1128_v36 }
 0x74e   :  { %1737 = vmatprep.mubr.msk.f32.mxu0 %vm1836_vm1, %v1832_v12 }
 0x74f   :  { %v1528_v18 = vld [vmem:[#allocation2] ss:$0 sm:$0xff] }
 0x819   :  { %v1711_v51 = vpop.f32.mrb[12].mxu0 }
 0x81a   :  { %v1217_v52 = vadd.f32 %v1711_v51, %v1132_v47  ;;  %v1211_v35 = vpop.f32.mrb[13].mxu0 }
 0x81b   :  { %v1212_v54 = vadd.f32 %v1211_v35, %v1132_v47 }
 0x81c   :  { %v1231_v55 = vmax.f32 %v1217_v52, 0.0 }
 0x81d   :  { %v1230_v56 = vmax.f32 %v1212_v54, 0.0 }
 0x81e   :  { %v1239_v16 = vrot.slane %v1231_v55, 4  ;;  %1272 = vrot.lane.b32.xlu1 %v1231_v55, %s1833_s15 }
 0x81f   :  { %v1238_v58 = vrot.slane %v1230_v56, 4  ;;  %1270 = vrot.lane.b32.xlu0 %v1230_v56, %s1833_s15 }
 0x820   :  { %v1714_v53 = vpop.f32.mrb[14].mxu0 }
 0x821   :  { %v1227_v61 = vadd.f32 %v1714_v53, %v1132_v47  ;;  %v1221_v57 = vpop.f32.mrb[15].mxu0  ;;  %v1244_v63 = vsel %vm722_vm13, %v1238_v58, %v1239_v16 }
 0x822   :  { %v1222_v0 = vadd.f32 %v1221_v57, %v1132_v47  ;;  %1256 = vrot.lane.b32.xlu1 %v1244_v63, %s1834_s20 }
 0x823   :  { %v1233_v1 = vmax.f32 %v1227_v61, 0.0 }
 0x824   :  { %v1232_v2 = vmax.f32 %v1222_v0, 0.0 }
 0x825   :  { %v1241_v3 = vrot.slane %v1233_v1, 4 }
 0x826   :  { %v1240_v4 = vrot.slane %v1232_v2, 4 }
 0x827   :  { %v1245_v42 = vsel %vm722_vm13, %v1241_v3, %v1238_v58 }
 0x828   :  { %v1246_v5 = vsel %vm727_vm14, %v1245_v42, 0.0  ;;  %v1242_v44 = vsel %vm722_vm13, %v1240_v4, %v1241_v3  ;;  %v1243_v6 = vsel %vm722_vm13, %v1239_v16, %v1240_v4 }
 0x829   :  { %1254 = vrot.lane.b32.xlu0 %v1246_v5, %s1834_s20  ;;  %1260 = vrot.lane.b32.xlu1 %v1242_v44, %s1834_s20  ;;  %v1248_v7 = vsel %vm729_vm15, %v1243_v6, 0.0 }
 0x82d   :  { %1258 = vrot.lane.b32.xlu0 %v1248_v7, %s1834_s20  ;;  %1276 = vrot.lane.b32.xlu1 %v1233_v1, %s1833_s15 }
 0x831   :  { %1274 = vrot.lane.b32.xlu0 %v1232_v2, %s1833_s15 }
 0x890   :  { %v1273_v34 = vpop.permute.xlu1 %1272 }
 0x891   :  { %v1271_v9 = vpop.permute.xlu0 %1270 }
 0x894   :  { %v1257_v10 = vpop.permute.xlu1 %1256 }
 0x895   :  { %v1283_v11 = vsel %vm69_vm0, %v1230_v56, %v1257_v10 }
 0x896   :  { %v1287_v39 = vsel %vm328_vm10, %v1283_v11, %v1273_v34 }
 0x89b   :  { %v1255_v13 = vpop.permute.xlu0 %1254  ;;  %v1261_v59 = vpop.permute.xlu1 %1260 }
 0x89c   :  { %v1282_v15 = vsel %vm69_vm0, 0.0, %v1255_v13  ;;  %v1285_v22 = vsel %vm69_vm0, %v1232_v2, %v1261_v59 }
 0x89d   :  { %v1286_v60 = vsel %vm328_vm10, %v1282_v15, %v1271_v9 }
 0x89e   :  { %1727 = vmatprep.mubr.msk.f32.mxu1 %vm337_vm11, %v1286_v60 }
 0x89f   :  { %v1259_v17 = vpop.permute.xlu0 %1258  ;;  %1728 = vmatmul.mubr.msk.f32.vlgmr.msra.gmra.mrb[12].mxu1 %vm337_vm11, %v1287_v39  ;;  %v1277_v19 = vpop.permute.xlu1 %1276 }
 0x8a0   :  { %v1284_v20 = vsel %vm69_vm0, 0.0, %v1259_v17  ;;  %v1289_v24 = vsel %vm328_vm10, %v1285_v22, %v1277_v19 }
 0x8a3   :  { %v1275_v21 = vpop.permute.xlu0 %1274 }
 0x8a4   :  { %v1288_v23 = vsel %vm328_vm10, %v1284_v20, %v1275_v21 }
 0x8a5   :  { %1730 = vmatprep.mubr.msk.f32.mxu1 %vm337_vm11, %v1288_v23 }
 0x8a6   :  { %1731 = vmatmul.mubr.msk.f32.gmra.mrb[14].mxu1 %vm337_vm11, %v1289_v24 }
 0x972   :  { %v1729_v31 = vpop.f32.mrb[12].mxu1 }
 0x973   :  { %v1377_v32 = vadd.f32 %v1729_v31, %v1293_v14  ;;  %v1372_v33 = vpop.f32.mrb[13].mxu1 }
 0x975   :  { %v1389_v36 = vmax.f32 %v1377_v32, 0.0 }
 0x977   :  { %v1391_v38 = vadd.f32 %v1389_v36, %v2284_v62 }
 0x979   :  { %v1732_v37 = vpop.f32.mrb[14].mxu1  ;;  %v1393_v12 = vmax.f32 %v1391_v38, 0.0 }
 0x97a   :  { %v1386_v41 = vadd.f32 %v1732_v37, %v1293_v14  ;;  %v1381_v43 = vpop.f32.mrb[15].mxu1 }
 0x97b   :  { %v1396_v45 = vrot.slane %v1393_v12, 7 }
 0x97c   :  { %v1390_v46 = vmax.f32 %v1386_v41, 0.0 }
 0x97e   :  { %v1392_v47 = vadd.f32 %v1390_v46, %v2295_v8 }
 0x980   :  { %v1394_v49 = vmax.f32 %v1392_v47, 0.0 }
 0x982   :  { %v1399_v48 = vrot.slane %v1394_v49, 6 }
 0x984   :  { %v1402_v28 = vsel %vm1401_vm2, %v1396_v45, %v1399_v48 }
 0x985   :  { %1738 = vmatmul.mubr.msk.f32.vlgmr.msra.gmra.mrb[16].mxu0 %vm69_vm0, %v1402_v28 }
 0xa58   :  { %v1481_v40 = vpop.f32.mrb[16].mxu0 }
 0xa59   :  { %v1482_v50 = vadd.f32 %v1528_v18, %v1481_v40  ;;  %v1739_v51 = vpop.f32.mrb[17].mxu0 }
 0xa5b   :  { %1486 = vst.msk [vmem:[%s2409_s10] sm:$0x3] %vm1485_vm3, %v1482_v50 }

</bundles_post_ra>
